<compile_context>
chip_gen: v6e
topology: v6e:2x2x1
jax: 0.10.0
libtpu: 0.0.40
codegen_flags: <defaults>
</compile_context>

<pallas_src>
import functools

import jax
import jax.numpy as jnp
from jax import lax
from jax.experimental import pallas as pl
from jax.experimental.pallas import tpu as pltpu

BN_EPS = 1e-5
LANE = 128


def _fc_kernel(x_ref, w_ref, p_ref, o_ref, acc_ref, *, with_bn, inv_n):
    """One (N, tn) output tile, accumulated over the K grid axis."""
    kk = pl.program_id(1)

    @pl.when(kk == 0)
    def _():
        acc_ref[...] = jnp.zeros_like(acc_ref)

    # x @ w.T on the MXU: contract x's lane dim against w's lane dim, i.e. the
    # PyTorch (out, in) weight tile is used directly (no wrapper transpose).
    # TODO(synk): verify in the Mosaic bundle dump that this transposed-RHS
    # contraction does not emit per-tile vxpose; if it does, pre-transpose W
    # once outside the kernel instead.
    acc_ref[...] += lax.dot_general(
        x_ref[...], w_ref[...],
        dimension_numbers=(((1,), (1,)), ((), ())),
        preferred_element_type=jnp.float32)

    @pl.when(kk == pl.num_programs(1) - 1)
    def _():
        lin = acc_ref[...]                                        # (N, TN) f32
        if with_bn:
            # Linear bias dropped: it cancels exactly in the mean subtraction.
            gamma = p_ref[0:1, :]                                 # (1, TN)
            beta = p_ref[1:2, :]                                  # (1, TN)
            mean = jnp.sum(lin, axis=0, keepdims=True) * inv_n
            mean_sq = jnp.sum(lin * lin, axis=0, keepdims=True) * inv_n
            var = jnp.maximum(mean_sq - mean * mean, 0.0)         # biased var
            scale = gamma * lax.rsqrt(var + BN_EPS)               # (1, TN)
            shift = beta - mean * scale                           # (1, TN)
            out = lin * scale + shift                             # one FMA/elem
        else:
            out = lin + p_ref[0:1, :]                             # + bias
        o_ref[...] = jnp.maximum(out, 0.0).astype(o_ref.dtype)


def _vmem_capacity_bytes():
    try:
        cap = getattr(pltpu.get_tpu_info(), "vmem_capacity_bytes", None)
        if cap:
            return int(cap)
    except Exception:
        pass
    return 64 << 20   # conservative fallback (safe on every generation)


def _select_tiles(n, k128, out128, elem, usable_bytes):
    """Pick (tn, tk) so the per-step VMEM residency fits `usable_bytes`."""
    tns = [t for t in (256, 128) if out128 % t == 0] or [LANE]
    for tn in tns:
        for cap in (4096, 2048, 1024, 512, 256, 128):
            tk = min(cap, k128)
            need = (2 * n * tk * elem           # x tile, double-buffered
                    + 2 * tn * tk * elem        # weight tile, double-buffered
                    + 2 * n * tn * 4            # output tile, double-buffered
                    + n * tn * 4                # f32 accumulator scratch
                    + 2 * 8 * tn * 4)           # packed params tile (padded)
            if need <= usable_bytes:
                return tn, tk
    # TODO(synk): shapes that land here need the N-tiled BN accumulation path.
    return tns[-1], LANE


def fully_connected_forward(x, weight, bias, gamma=None, beta=None, *,
                            with_bn=True, matmul_dtype=jnp.bfloat16,
                            tn=None, tk=None):
    """x: (N, inp_dim); weight: (out_dim, inp_dim) PyTorch layout;
    bias/gamma/beta: (out_dim,). Returns (N, out_dim) float32."""
    n, k = x.shape
    out_dim, k_w = weight.shape
    assert k_w == k, "weight must be (out_dim, inp_dim)"

    elem = jnp.dtype(matmul_dtype).itemsize

    # Generation-aware scoped-VMEM limit: ~48 MiB on v7x (64 MiB physical),
    # ~96 MiB on v5e/v6e (128 MiB physical).
    vmem_cap = _vmem_capacity_bytes()
    vmem_limit = min(vmem_cap * 3 // 4, 100 << 20)

    k128 = pl.cdiv(k, LANE) * LANE
    out128 = pl.cdiv(out_dim, LANE) * LANE
    if tn is None or tk is None:
        tn_sel, tk_sel = _select_tiles(n, k128, out128, elem,
                                       usable_bytes=int(vmem_limit * 0.7))
        tn = tn if tn is not None else tn_sel
        tk = tk if tk is not None else tk_sel

    out_pad = pl.cdiv(out_dim, tn) * tn
    k_pad = pl.cdiv(k, tk) * tk
    kt = k_pad // tk
    jt = out_pad // tn

    # Packed per-feature params: (gamma, beta) under BN (bias cancels), else
    # just the bias.
    if with_bn:
        if gamma is None:
            gamma = jnp.ones((out_dim,), jnp.float32)
        if beta is None:
            beta = jnp.zeros((out_dim,), jnp.float32)
        params = jnp.stack([gamma.astype(jnp.float32),
                            beta.astype(jnp.float32)], axis=0)    # (2, out)
    else:
        params = bias.astype(jnp.float32)[None, :]                # (1, out)
    n_rows = params.shape[0]

    x_in = x.astype(matmul_dtype)
    w_in = weight.astype(matmul_dtype)
    if k_pad != k:
        x_in = jnp.pad(x_in, ((0, 0), (0, k_pad - k)))
        w_in = jnp.pad(w_in, ((0, 0), (0, k_pad - k)))
    if out_pad != out_dim:
        w_in = jnp.pad(w_in, ((0, out_pad - out_dim), (0, 0)))
        params = jnp.pad(params, ((0, 0), (0, out_pad - out_dim)))

    kernel = functools.partial(_fc_kernel, with_bn=with_bn, inv_n=1.0 / n)

    cost = pl.CostEstimate(
        flops=2 * n * k_pad * out_pad + 10 * n * out_pad,
        transcendentals=out_pad,                      # rsqrt per feature
        bytes_accessed=(n * k_pad * (jt if kt > 1 else 1) * elem  # x (re)reads
                        + out_pad * k_pad * elem                  # W once
                        + params.size * 4
                        + n * out_pad * 4),
    )

    x_map = lambda j, kk: (0, kk)
    w_spec = pl.BlockSpec((tn, tk), lambda j, kk: (j, kk))
    p_spec = pl.BlockSpec((n_rows, tn), lambda j, kk: (0, j))
    o_spec = pl.BlockSpec((n, tn), lambda j, kk: (0, j))

    def _run(x_pipeline_mode):
        if x_pipeline_mode is None:
            x_spec = pl.BlockSpec((n, tk), x_map)
        else:
            x_spec = pl.BlockSpec((n, tk), x_map,
                                  pipeline_mode=x_pipeline_mode)
        return pl.pallas_call(
            kernel,
            out_shape=jax.ShapeDtypeStruct((n, out_pad), jnp.float32),
            grid=(jt, kt),
            in_specs=[x_spec, w_spec, p_spec],
            out_specs=o_spec,
            scratch_shapes=[pltpu.VMEM((n, tn), jnp.float32)],
            compiler_params=pltpu.CompilerParams(
                dimension_semantics=("parallel", "arbitrary"),
                vmem_limit_bytes=vmem_limit),
            cost_estimate=cost,
        )(x_in, w_in, params)

    if kt == 1:
        # x's index map is constant across the whole grid -> single-buffer it.
        try:
            out = _run(pl.Buffered(1))
        except Exception:
            out = _run(None)
    else:
        out = _run(None)

    if out_pad != out_dim:
        out = out[:, :out_dim]
    return out


def _reference(x, weight, bias, gamma, beta):
    lin = x @ weight.T + bias
    mean = lin.mean(axis=0, keepdims=True)
    var = ((lin - mean) ** 2).mean(axis=0, keepdims=True)
    bn = (lin - mean) / jnp.sqrt(var + BN_EPS) * gamma + beta
    return jnp.maximum(bn, 0.0)


if __name__ == "__main__":
    key = jax.random.PRNGKey(0)
    batch, inp_dim, out_dim = 8, 32, 256   # out_dim spans two 128-lane tiles

    k_x, k_w, k_b = jax.random.split(key, 3)

    # Deterministic "PyTorch-like" init: Linear weight/bias ~ U(-1/sqrt(in), 1/sqrt(in))
    bound = 1.0 / (inp_dim ** 0.5)
    x = jax.random.normal(k_x, (batch, inp_dim), dtype=jnp.float32)
    weight = jax.random.uniform(k_w, (out_dim, inp_dim), jnp.float32, -bound, bound)
    bias = jax.random.uniform(k_b, (out_dim,), jnp.float32, -bound, bound)
    # BatchNorm1d defaults: gamma = 1, beta = 0
    gamma = jnp.ones((out_dim,), jnp.float32)
    beta = jnp.zeros((out_dim,), jnp.float32)

    # 1) Exactness check: f32 operand path vs f32 reference.
    out_f32 = jax.block_until_ready(
        fully_connected_forward(x, weight, bias, gamma, beta,
                                matmul_dtype=jnp.float32))
    ref_f32 = _reference(x, weight, bias, gamma, beta)
    assert out_f32.shape == (batch, out_dim)
    assert jnp.allclose(out_f32, ref_f32, atol=1e-4, rtol=1e-4), \
        "f32 path mismatch vs reference"

    # 2) Default (bf16-operand) path vs reference on bf16-rounded inputs.
    out_bf16 = jax.block_until_ready(
        fully_connected_forward(x, weight, bias, gamma, beta))
    xq = x.astype(jnp.bfloat16).astype(jnp.float32)
    wq = weight.astype(jnp.bfloat16).astype(jnp.float32)
    ref_bf16 = _reference(xq, wq, bias, gamma, beta)
    assert out_bf16.shape == (batch, out_dim)
    assert jnp.allclose(out_bf16, ref_bf16, atol=2e-2, rtol=2e-2), \
        "bf16 path mismatch vs bf16-rounded reference"

    # 3) with_bn=False path (Linear + bias + ReLU only).
    out_nobn = jax.block_until_ready(
        fully_connected_forward(x, weight, bias, with_bn=False,
                                matmul_dtype=jnp.float32))
    ref_nobn = jnp.maximum(x @ weight.T + bias, 0.0)
    assert jnp.allclose(out_nobn, ref_nobn, atol=1e-5, rtol=1e-5), \
        "with_bn=False path mismatch vs reference"

    print("KERNEL_OK")
</pallas_src>

<mosaic_0001>
module attributes {stable_mosaic.version = 11 : i64} {
  func.func @_fc_kernel(%arg0: i32, %arg1: i32, %arg2: memref<8x128xf32, #tpu.memory_space<vmem>>, %arg3: memref<256x128xf32, #tpu.memory_space<vmem>>, %arg4: memref<2x256xf32, #tpu.memory_space<vmem>>, %arg5: memref<8x256xf32, #tpu.memory_space<vmem>>, %arg6: memref<8x256xf32, #tpu.memory_space<vmem>>) attributes {dimension_semantics = [#tpu.dimension_semantics<parallel>, #tpu.dimension_semantics<arbitrary>], iteration_bounds = array<i64: 1, 1>, scalar_prefetch = 0 : i64, scratch_operands = 1 : i64, tpu.core_type = #tpu.core_type<tc>, window_params = [{pipeline_mode = #tpu.pipeline_mode<synchronous>, transform_indices = @transform_0, window_bounds = array<i64: 8, 128>}, {transform_indices = @transform_1, window_bounds = array<i64: 256, 128>}, {transform_indices = @transform_2, window_bounds = array<i64: 2, 256>}, {transform_indices = @transform_3, window_bounds = array<i64: 8, 256>}]} {
    %c0_i32 = arith.constant 0 : i32
    %0 = arith.cmpi eq, %arg1, %c0_i32 : i32
    %1 = arith.extui %0 : i1 to i32
    %c0_i32_0 = arith.constant 0 : i32
    %2 = arith.cmpi ne, %1, %c0_i32_0 : i32
    scf.if %2 {
      %cst_10 = arith.constant 0.000000e+00 : f32
      %12 = vector.broadcast %cst_10 : f32 to vector<8x256xf32>
      %c0_11 = arith.constant 0 : index
      %c0_12 = arith.constant 0 : index
      %13 = vector.load %arg6[%c0_11, %c0_12] : memref<8x256xf32, #tpu.memory_space<vmem>>, vector<8x256xf32>
      tpu.vector_store %arg6[%c0_11, %c0_12], %12 {strides = array<i32>} : memref<8x256xf32, #tpu.memory_space<vmem>>, vector<8x256xf32>,
    } else {
    }
    %c0 = arith.constant 0 : index
    %c0_1 = arith.constant 0 : index
    %3 = vector.load %arg6[%c0, %c0_1] : memref<8x256xf32, #tpu.memory_space<vmem>>, vector<8x256xf32>
    %c0_2 = arith.constant 0 : index
    %c0_3 = arith.constant 0 : index
    %4 = vector.load %arg2[%c0_2, %c0_3] : memref<8x128xf32, #tpu.memory_space<vmem>>, vector<8x128xf32>
    %c0_4 = arith.constant 0 : index
    %c0_5 = arith.constant 0 : index
    %5 = vector.load %arg3[%c0_4, %c0_5] : memref<256x128xf32, #tpu.memory_space<vmem>>, vector<256x128xf32>
    %cst = arith.constant dense<0.000000e+00> : vector<8x256xf32>
    %6 = tpu.matmul %4, %5, %cst {dimension_numbers = #tpu.dot_dimension_numbers<[1], [1], [0], [0], [0, 0, 1, 0], [], []>} : vector<8x128xf32>, vector<256x128xf32>, vector<8x256xf32> -> vector<8x256xf32>
    %7 = arith.addf %3, %6 : vector<8x256xf32>
    %c0_6 = arith.constant 0 : index
    %c0_7 = arith.constant 0 : index
    %8 = vector.load %arg6[%c0_6, %c0_7] : memref<8x256xf32, #tpu.memory_space<vmem>>, vector<8x256xf32>
    tpu.vector_store %arg6[%c0_6, %c0_7], %7 {strides = array<i32>} : memref<8x256xf32, #tpu.memory_space<vmem>>, vector<8x256xf32>,
    %c0_i32_8 = arith.constant 0 : i32
    %9 = arith.cmpi eq, %arg1, %c0_i32_8 : i32
    %10 = arith.extui %9 : i1 to i32
    %c0_i32_9 = arith.constant 0 : i32
    %11 = arith.cmpi ne, %10, %c0_i32_9 : i32
    scf.if %11 {
      %c0_10 = arith.constant 0 : index
      %c0_11 = arith.constant 0 : index
      %12 = vector.load %arg6[%c0_10, %c0_11] : memref<8x256xf32, #tpu.memory_space<vmem>>, vector<8x256xf32>
      %c0_12 = arith.constant 0 : index
      %c0_13 = arith.constant 0 : index
      %13 = vector.load %arg4[%c0_12, %c0_13] : memref<2x256xf32, #tpu.memory_space<vmem>>, vector<1x256xf32>
      %c1 = arith.constant 1 : index
      %c0_14 = arith.constant 0 : index
      %14 = vector.load %arg4[%c1, %c0_14] : memref<2x256xf32, #tpu.memory_space<vmem>>, vector<1x256xf32>
      %cst_15 = arith.constant dense<0.000000e+00> : vector<256xf32>
      %15 = vector.multi_reduction <add>, %12, %cst_15 [0] : vector<8x256xf32> to vector<256xf32>
      %16 = vector.shape_cast %15 : vector<256xf32> to vector<1x256xf32>
      %cst_16 = arith.constant 1.250000e-01 : f32
      %17 = vector.broadcast %cst_16 : f32 to vector<1x256xf32>
      %18 = arith.mulf %16, %17 : vector<1x256xf32>
      %19 = arith.mulf %12, %12 : vector<8x256xf32>
      %cst_17 = arith.constant dense<0.000000e+00> : vector<256xf32>
      %20 = vector.multi_reduction <add>, %19, %cst_17 [0] : vector<8x256xf32> to vector<256xf32>
      %21 = vector.shape_cast %20 : vector<256xf32> to vector<1x256xf32>
      %cst_18 = arith.constant 1.250000e-01 : f32
      %22 = vector.broadcast %cst_18 : f32 to vector<1x256xf32>
      %23 = arith.mulf %21, %22 : vector<1x256xf32>
      %24 = arith.mulf %18, %18 : vector<1x256xf32>
      %25 = arith.subf %23, %24 : vector<1x256xf32>
      %cst_19 = arith.constant 0.000000e+00 : f32
      %26 = vector.broadcast %cst_19 : f32 to vector<1x256xf32>
      %27 = arith.maximumf %25, %26 : vector<1x256xf32>
      %cst_20 = arith.constant 9.99999974E-6 : f32
      %28 = vector.broadcast %cst_20 : f32 to vector<1x256xf32>
      %29 = arith.addf %27, %28 : vector<1x256xf32>
      %30 = math.rsqrt %29 : vector<1x256xf32>
      %31 = arith.mulf %13, %30 : vector<1x256xf32>
      %32 = arith.mulf %18, %31 : vector<1x256xf32>
      %33 = arith.subf %14, %32 : vector<1x256xf32>
      %34 = vector.broadcast %31 : vector<1x256xf32> to vector<8x256xf32>
      %35 = arith.mulf %12, %34 : vector<8x256xf32>
      %36 = vector.broadcast %33 : vector<1x256xf32> to vector<8x256xf32>
      %37 = arith.addf %35, %36 : vector<8x256xf32>
      %cst_21 = arith.constant 0.000000e+00 : f32
      %38 = vector.broadcast %cst_21 : f32 to vector<8x256xf32>
      %39 = arith.maximumf %37, %38 : vector<8x256xf32>
      %c0_22 = arith.constant 0 : index
      %c0_23 = arith.constant 0 : index
      %40 = vector.load %arg5[%c0_22, %c0_23] : memref<8x256xf32, #tpu.memory_space<vmem>>, vector<8x256xf32>
      tpu.vector_store %arg5[%c0_22, %c0_23], %39 {strides = array<i32>} : memref<8x256xf32, #tpu.memory_space<vmem>>, vector<8x256xf32>,
    } else {
    }
    return
  }
  func.func @transform_0(%arg0: i32, %arg1: i32) -> (i32, i32) {
    %c0_i32 = arith.constant 0 : i32
    %c0_i32_0 = arith.constant 0 : i32
    return %c0_i32, %arg1 : i32, i32
  }
  func.func @transform_1(%arg0: i32, %arg1: i32) -> (i32, i32) {
    %c0_i32 = arith.constant 0 : i32
    return %arg0, %arg1 : i32, i32
  }
  func.func @transform_2(%arg0: i32, %arg1: i32) -> (i32, i32) {
    %c0_i32 = arith.constant 0 : i32
    %c0_i32_0 = arith.constant 0 : i32
    return %c0_i32, %arg0 : i32, i32
  }
  func.func @transform_3(%arg0: i32, %arg1: i32) -> (i32, i32) {
    %c0_i32 = arith.constant 0 : i32
    %c0_i32_0 = arith.constant 0 : i32
    return %c0_i32, %arg0 : i32, i32
  }
}

module attributes {stable_mosaic.version = 11 : i64} {
  func.func @_fc_kernel(%arg0: i32, %arg1: i32, %arg2: memref<8x128xf32, #tpu.memory_space<vmem>>, %arg3: memref<256x128xf32, #tpu.memory_space<vmem>>, %arg4: memref<2x256xf32, #tpu.memory_space<vmem>>, %arg5: memref<8x256xf32, #tpu.memory_space<vmem>>, %arg6: memref<8x256xf32, #tpu.memory_space<vmem>>) attributes {dimension_semantics = [#tpu.dimension_semantics<parallel>, #tpu.dimension_semantics<arbitrary>], iteration_bounds = array<i64: 1, 1>, scalar_prefetch = 0 : i64, scratch_operands = 1 : i64, tpu.core_type = #tpu.core_type<tc>, window_params = [{transform_indices = @transform_0, window_bounds = array<i64: 8, 128>}, {transform_indices = @transform_1, window_bounds = array<i64: 256, 128>}, {transform_indices = @transform_2, window_bounds = array<i64: 2, 256>}, {transform_indices = @transform_3, window_bounds = array<i64: 8, 256>}]} {
    %c0_i32 = arith.constant 0 : i32
    %0 = arith.cmpi eq, %arg1, %c0_i32 : i32
    %1 = arith.extui %0 : i1 to i32
    %c0_i32_0 = arith.constant 0 : i32
    %2 = arith.cmpi ne, %1, %c0_i32_0 : i32
    scf.if %2 {
      %cst_10 = arith.constant 0.000000e+00 : f32
      %12 = vector.broadcast %cst_10 : f32 to vector<8x256xf32>
      %c0_11 = arith.constant 0 : index
      %c0_12 = arith.constant 0 : index
      %13 = vector.load %arg6[%c0_11, %c0_12] : memref<8x256xf32, #tpu.memory_space<vmem>>, vector<8x256xf32>
      tpu.vector_store %arg6[%c0_11, %c0_12], %12 {strides = array<i32>} : memref<8x256xf32, #tpu.memory_space<vmem>>, vector<8x256xf32>,
    } else {
    }
    %c0 = arith.constant 0 : index
    %c0_1 = arith.constant 0 : index
    %3 = vector.load %arg6[%c0, %c0_1] : memref<8x256xf32, #tpu.memory_space<vmem>>, vector<8x256xf32>
    %c0_2 = arith.constant 0 : index
    %c0_3 = arith.constant 0 : index
    %4 = vector.load %arg2[%c0_2, %c0_3] : memref<8x128xf32, #tpu.memory_space<vmem>>, vector<8x128xf32>
    %c0_4 = arith.constant 0 : index
    %c0_5 = arith.constant 0 : index
    %5 = vector.load %arg3[%c0_4, %c0_5] : memref<256x128xf32, #tpu.memory_space<vmem>>, vector<256x128xf32>
    %cst = arith.constant dense<0.000000e+00> : vector<8x256xf32>
    %6 = tpu.matmul %4, %5, %cst {dimension_numbers = #tpu.dot_dimension_numbers<[1], [1], [0], [0], [0, 0, 1, 0], [], []>} : vector<8x128xf32>, vector<256x128xf32>, vector<8x256xf32> -> vector<8x256xf32>
    %7 = arith.addf %3, %6 : vector<8x256xf32>
    %c0_6 = arith.constant 0 : index
    %c0_7 = arith.constant 0 : index
    %8 = vector.load %arg6[%c0_6, %c0_7] : memref<8x256xf32, #tpu.memory_space<vmem>>, vector<8x256xf32>
    tpu.vector_store %arg6[%c0_6, %c0_7], %7 {strides = array<i32>} : memref<8x256xf32, #tpu.memory_space<vmem>>, vector<8x256xf32>,
    %c0_i32_8 = arith.constant 0 : i32
    %9 = arith.cmpi eq, %arg1, %c0_i32_8 : i32
    %10 = arith.extui %9 : i1 to i32
    %c0_i32_9 = arith.constant 0 : i32
    %11 = arith.cmpi ne, %10, %c0_i32_9 : i32
    scf.if %11 {
      %c0_10 = arith.constant 0 : index
      %c0_11 = arith.constant 0 : index
      %12 = vector.load %arg6[%c0_10, %c0_11] : memref<8x256xf32, #tpu.memory_space<vmem>>, vector<8x256xf32>
      %c0_12 = arith.constant 0 : index
      %c0_13 = arith.constant 0 : index
      %13 = vector.load %arg4[%c0_12, %c0_13] : memref<2x256xf32, #tpu.memory_space<vmem>>, vector<1x256xf32>
      %c1 = arith.constant 1 : index
      %c0_14 = arith.constant 0 : index
      %14 = vector.load %arg4[%c1, %c0_14] : memref<2x256xf32, #tpu.memory_space<vmem>>, vector<1x256xf32>
      %cst_15 = arith.constant dense<0.000000e+00> : vector<256xf32>
      %15 = vector.multi_reduction <add>, %12, %cst_15 [0] : vector<8x256xf32> to vector<256xf32>
      %16 = vector.shape_cast %15 : vector<256xf32> to vector<1x256xf32>
      %cst_16 = arith.constant 1.250000e-01 : f32
      %17 = vector.broadcast %cst_16 : f32 to vector<1x256xf32>
      %18 = arith.mulf %16, %17 : vector<1x256xf32>
      %19 = arith.mulf %12, %12 : vector<8x256xf32>
      %cst_17 = arith.constant dense<0.000000e+00> : vector<256xf32>
      %20 = vector.multi_reduction <add>, %19, %cst_17 [0] : vector<8x256xf32> to vector<256xf32>
      %21 = vector.shape_cast %20 : vector<256xf32> to vector<1x256xf32>
      %cst_18 = arith.constant 1.250000e-01 : f32
      %22 = vector.broadcast %cst_18 : f32 to vector<1x256xf32>
      %23 = arith.mulf %21, %22 : vector<1x256xf32>
      %24 = arith.mulf %18, %18 : vector<1x256xf32>
      %25 = arith.subf %23, %24 : vector<1x256xf32>
      %cst_19 = arith.constant 0.000000e+00 : f32
      %26 = vector.broadcast %cst_19 : f32 to vector<1x256xf32>
      %27 = arith.maximumf %25, %26 : vector<1x256xf32>
      %cst_20 = arith.constant 9.99999974E-6 : f32
      %28 = vector.broadcast %cst_20 : f32 to vector<1x256xf32>
      %29 = arith.addf %27, %28 : vector<1x256xf32>
      %30 = math.rsqrt %29 : vector<1x256xf32>
      %31 = arith.mulf %13, %30 : vector<1x256xf32>
      %32 = arith.mulf %18, %31 : vector<1x256xf32>
      %33 = arith.subf %14, %32 : vector<1x256xf32>
      %34 = vector.broadcast %31 : vector<1x256xf32> to vector<8x256xf32>
      %35 = arith.mulf %12, %34 : vector<8x256xf32>
      %36 = vector.broadcast %33 : vector<1x256xf32> to vector<8x256xf32>
      %37 = arith.addf %35, %36 : vector<8x256xf32>
      %cst_21 = arith.constant 0.000000e+00 : f32
      %38 = vector.broadcast %cst_21 : f32 to vector<8x256xf32>
      %39 = arith.maximumf %37, %38 : vector<8x256xf32>
      %c0_22 = arith.constant 0 : index
      %c0_23 = arith.constant 0 : index
      %40 = vector.load %arg5[%c0_22, %c0_23] : memref<8x256xf32, #tpu.memory_space<vmem>>, vector<8x256xf32>
      tpu.vector_store %arg5[%c0_22, %c0_23], %39 {strides = array<i32>} : memref<8x256xf32, #tpu.memory_space<vmem>>, vector<8x256xf32>,
    } else {
    }
    return
  }
  func.func @transform_0(%arg0: i32, %arg1: i32) -> (i32, i32) {
    %c0_i32 = arith.constant 0 : i32
    %c0_i32_0 = arith.constant 0 : i32
    return %c0_i32, %arg1 : i32, i32
  }
  func.func @transform_1(%arg0: i32, %arg1: i32) -> (i32, i32) {
    %c0_i32 = arith.constant 0 : i32
    return %arg0, %arg1 : i32, i32
  }
  func.func @transform_2(%arg0: i32, %arg1: i32) -> (i32, i32) {
    %c0_i32 = arith.constant 0 : i32
    %c0_i32_0 = arith.constant 0 : i32
    return %c0_i32, %arg0 : i32, i32
  }
  func.func @transform_3(%arg0: i32, %arg1: i32) -> (i32, i32) {
    %c0_i32 = arith.constant 0 : i32
    %c0_i32_0 = arith.constant 0 : i32
    return %c0_i32, %arg0 : i32, i32
  }
}

</mosaic_0001>

<bundles_post_ra>
// kernel: tpu_custom_call.1
= control target key start
LH: loop header
LB: loop body
LE: loop exit
PB: predicated region body
PF: predicated region fallthrough
CT: control target
= control target key end

     0   :  { %8 = vsyncpa [#allocation4], 0  ;;  %s486_s0 = inlined_call_operand.hbm [shape: f32[8,128], index: 0, kind: input, shape index: {}]   ;;  %s487_s1 = inlined_call_operand.hbm [shape: f32[256,128], index: 1, kind: input, shape index: {}]   ;;  %s488_s2 = inlined_call_operand.hbm [shape: f32[2,256], index: 2, kind: input, shape index: {}]   ;;  %s489_s3 = inlined_call_operand.hbm [shape: f32[8,256], index: 3, kind: output, shape index: {}]  }
   0x1   :  { %9 = vsyncpa [#allocation7], 0 }
   0x2   :  { %10 = vsyncpa [#allocation5], 0  ;;  %s433_s12 = smov [#allocation6]  }
   0x3   :  { %s26_s13 = sshll.u32 %s433_s12, 4  ;;  %s27_s13 = int_to_ptr.vmem [resolvable:$true] %s26_s13 }
   0x4   :  { %s355_s14 = scalar_lea.vmem %s27_s13, 4096  ;;  %p360_p1 = scmp.lt.s32.totalorder %s27_s13, %s27_s13 }
   0x5   :  { %p356_p0 = scmp.ne.s32.totalorder %s27_s13, %s355_s14  ;;  %p361_p2 = scmp.lt.s32.totalorder %s355_s14, %s355_s14 }
   0x7   :  { %p362_p3 = por %p361_p2, %p360_p1 }
   0x9   :  { %p363_p4 = pnand %p362_p3, %p356_p0 }
   0xb   :  { %366 = shalt.err (!%p363_p4)
}
   0xc   :  { %s434_s15 = smov 128   ;;  %s435_s16 = smov 8  }
   0xd   :  { %32 = dma.hbm_to_vmem [thread:$0]  %s487_s1, 4096, %s27_s13, [#allocation7], %s434_s15, %s434_s15, %s435_s16  }
   0xe   :  { %s436_s19 = smov [#allocation3]   ;;  %s437_s21 = smov [#allocation8]  }
   0xf   :  { %s17_s20 = sshll.u32 %s436_s19, 4  ;;  %s39_s22 = sshll.u32 %s437_s21, 4  ;;  %s18_s20 = int_to_ptr.vmem [resolvable:$true] %s17_s20  ;;  %s40_s22 = int_to_ptr.vmem [resolvable:$true] %s39_s22 }
  0x10   :  { %s375_s23 = scalar_lea.vmem %s18_s20, 128  ;;  %p380_p6 = scmp.lt.s32.totalorder %s18_s20, %s18_s20 }
  0x11   :  { %p376_p5 = scmp.ne.s32.totalorder %s18_s20, %s375_s23  ;;  %p381_p7 = scmp.lt.s32.totalorder %s375_s23, %s375_s23 }
  0x13   :  { %p382_p8 = por %p381_p7, %p380_p6 }
  0x15   :  { %p383_p9 = pnand %p382_p8, %p376_p5 }
  0x17   :  { %386 = shalt.err (!%p383_p9)
}
  0x18   :  { %20 = dma.hbm_to_vmem [thread:$0]  %s486_s0, 128, %s18_s20, [#allocation4]  }
  0x19   :  { %s395_s26 = scalar_lea.vmem %s40_s22, 64  ;;  %p400_p11 = scmp.lt.s32.totalorder %s40_s22, %s40_s22 }
  0x1a   :  { %p396_p10 = scmp.ne.s32.totalorder %s40_s22, %s395_s26  ;;  %p401_p12 = scmp.lt.s32.totalorder %s395_s26, %s395_s26 }
  0x1c   :  { %p402_p13 = por %p401_p12, %p400_p11 }
  0x1e   :  { %p403_p0 = pnand %p402_p13, %p396_p10 }
  0x20   :  { %406 = shalt.err (!%p403_p0)
}
  0x21   :  { %42 = dma.hbm_to_vmem [thread:$0]  %s488_s2, 64, %s40_s22, [#allocation7]  }
  0x22   :  { %427 = dma.done.wait [#allocation4], 128  }
  0x23   :  { %428 = vsyncadd [#allocation4], 4294967168 }
  0x24   :  { %429 = dma.done.wait [#allocation7], 4160  }
  0x25   :  { %430 = vsyncadd [#allocation7], 4294963136  ;;  %v92_v0 = vld [vmem:[#allocation6 + $0xf8] sm:$0xff]  ;;  %v91_v2 = vld [vmem:[#allocation6 + $0xf0] sm:$0xff]  ;;  %s439_s0 = smov [#allocation9]  }
  0x26   :  { %v76_v1 = vld [vmem:[#allocation6 + $0x78] sm:$0xff]  ;;  %302 = vmatprep.subr.mxu0 %v92_v0  ;;  %v75_v3 = vld [vmem:[#allocation6 + $0x70] sm:$0xff]  ;;  %v90_v4 = vld [vmem:[#allocation6 + $0xe8] sm:$0xff]  ;;  %s292_s2 = sshll.u32 %s439_s0, 4  ;;  %s293_s2 = int_to_ptr.vmem [resolvable:$true] %s292_s2 }
  0x27   :  { %303 = vmatpush3.xpose.msra.mxu0 %v76_v1  ;;  %v74_v5 = vld [vmem:[#allocation6 + $0x68] sm:$0xff]  ;;  %v89_v6 = vld [vmem:[#allocation6 + $0xe0] sm:$0xff]  ;;  %v60_v7 = vld [vmem:[#allocation3] sm:$0xff]  ;;  %s407_s28 = scalar_lea.vmem %s293_s2, 256  ;;  %p412_p2 = scmp.lt.s32.totalorder %s293_s2, %s293_s2 }
  0x28   :  { %304 = vmatprep.subr.mxu0 %v91_v2  ;;  %v73_v8 = vld [vmem:[#allocation6 + $0x60] sm:$0xff]  ;;  %334 = vmatprep.mubr.f32.mxu0 %v60_v7  ;;  %v88_v9 = vld [vmem:[#allocation6 + $0xd8] sm:$0xff]  ;;  %v87_v11 = vld [vmem:[#allocation6 + $0xd0] sm:$0xff]  ;;  %p408_p1 = scmp.ne.s32.totalorder %s293_s2, %s407_s28  ;;  %p413_p3 = scmp.lt.s32.totalorder %s407_s28, %s407_s28 }
  0x29   :  { %v72_v10 = vld [vmem:[#allocation6 + $0x58] sm:$0xff]  ;;  %v71_v12 = vld [vmem:[#allocation6 + $0x50] sm:$0xff]  ;;  %v86_v13 = vld [vmem:[#allocation6 + $0xc8] sm:$0xff] }
  0x2a   :  { %v70_v14 = vld [vmem:[#allocation6 + $0x48] sm:$0xff]  ;;  %v85_v15 = vld [vmem:[#allocation6 + $0xc0] sm:$0xff]  ;;  %v84_v17 = vld [vmem:[#allocation6 + $0xb8] sm:$0xff]  ;;  %p414_p4 = por %p413_p3, %p412_p2 }
  0x2b   :  { %305 = vmatpush3.xpose.msra.mxu0 %v75_v3  ;;  %v69_v16 = vld [vmem:[#allocation6 + $0x40] sm:$0xff]  ;;  %v68_v18 = vld [vmem:[#allocation6 + $0x38] sm:$0xff]  ;;  %v83_v19 = vld [vmem:[#allocation6 + $0xb0] sm:$0xff] }
  0x2c   :  { %306 = vmatprep.subr.mxu0 %v90_v4  ;;  %v67_v20 = vld [vmem:[#allocation6 + $0x30] sm:$0xff]  ;;  %v82_v21 = vld [vmem:[#allocation6 + $0xa8] sm:$0xff]  ;;  %v81_v23 = vld [vmem:[#allocation6 + $0xa0] sm:$0xff]  ;;  %p415_p5 = pnand %p414_p4, %p408_p1 }
  0x2d   :  { %v66_v22 = vld [vmem:[#allocation6 + $0x28] sm:$0xff]  ;;  %v65_v24 = vld [vmem:[#allocation6 + $0x20] sm:$0xff]  ;;  %v80_v25 = vld [vmem:[#allocation6 + $0x98] sm:$0xff] }
  0x2e   :  { %v64_v26 = vld [vmem:[#allocation6 + $0x18] sm:$0xff]  ;;  %v79_v27 = vld [vmem:[#allocation6 + $0x90] sm:$0xff]  ;;  %v78_v29 = vld [vmem:[#allocation6 + $0x88] sm:$0xff] }
  0x2f   :  { %307 = vmatpush3.xpose.msra.mxu0 %v74_v5  ;;  %v63_v28 = vld [vmem:[#allocation6 + $0x10] sm:$0xff]  ;;  %v62_v30 = vld [vmem:[#allocation6 + $0x8] sm:$0xff]  ;;  %v77_v31 = vld [vmem:[#allocation6 + $0x80] sm:$0xff] }
  0x30   :  { %308 = vmatprep.subr.mxu0 %v89_v6  ;;  %v61_v32 = vld [vmem:[#allocation6] sm:$0xff] }
  0x33   :  { %309 = vmatpush3.xpose.msra.mxu0 %v73_v8 }
  0x34   :  { %310 = vmatprep.subr.mxu0 %v88_v9  ;;  %v438_v9 = vmov 1966171168  }
  0x37   :  { %311 = vmatpush3.xpose.msra.mxu0 %v72_v10  ;;  %v220_v10 = vunpack.c.l.s4 %v438_v9 }
  0x38   :  { %312 = vmatprep.subr.mxu0 %v87_v11  ;;  %v222_v11 = vlaneseq }
  0x3b   :  { %313 = vmatpush3.xpose.msra.mxu0 %v71_v12  ;;  %v221_v12 = vunpack.c.0.s8 %v220_v10 }
  0x3c   :  { %314 = vmatprep.subr.mxu0 %v86_v13  ;;  %v223_v13 = vshrl.u32 %v222_v11, 7 }
  0x3f   :  { %315 = vmatpush3.xpose.msra.mxu0 %v70_v14 }
  0x40   :  { %316 = vmatprep.subr.mxu0 %v85_v15  ;;  %v224_v15 = vsub.s32 %v221_v12, %v223_v13 }
  0x43   :  { %317 = vmatpush3.xpose.msra.mxu0 %v69_v16 }
  0x44   :  { %318 = vmatprep.subr.mxu0 %v84_v17 }
  0x47   :  { %319 = vmatpush3.xpose.msra.mxu0 %v68_v18 }
  0x48   :  { %320 = vmatprep.subr.mxu0 %v83_v19  ;;  %v173_v19 = vld [vmem:[#allocation8] ss:$2 sm:$0x3] }
  0x4b   :  { %321 = vmatpush3.xpose.msra.mxu0 %v67_v20 }
  0x4c   :  { %322 = vmatprep.subr.mxu0 %v82_v21  ;;  %v238_v21 = vsub.s32 0, %v223_v13 }
  0x4f   :  { %323 = vmatpush3.xpose.msra.mxu0 %v66_v22  ;;  %v242_v22 = vsub.s32 1, %v223_v13 }
  0x50   :  { %324 = vmatprep.subr.mxu0 %v81_v23 }
  0x53   :  { %325 = vmatpush3.xpose.msra.mxu0 %v65_v24 }
  0x54   :  { %326 = vmatprep.subr.mxu0 %v80_v25 }
  0x57   :  { %327 = vmatpush3.xpose.msra.mxu0 %v64_v26 }
  0x58   :  { %328 = vmatprep.subr.mxu0 %v79_v27 }
  0x5b   :  { %329 = vmatpush3.xpose.msra.mxu0 %v63_v28 }
  0x5c   :  { %330 = vmatprep.subr.mxu0 %v78_v29 }
  0x5f   :  { %331 = vmatpush3.xpose.msra.mxu0 %v62_v30  ;;  %v175_v30 = vld [vmem:[#allocation8 + $0x1] ss:$2 sm:$0x3] }
  0x60   :  { %332 = vmatprep.subr.mxu0 %v77_v31 }
  0x63   :  { %333 = vmatpush3.xpose.msra.mxu0 %v61_v32 }
  0x66   :  { %335 = vmatmul.mubr.f32.vlgmr.msra.gmra.mxu0 %v60_v7 }
 0x126   :  { %v469_v33 = vpop.f32.mrf.mxu0 }
 0x127   :  { %v176_v34 = vrot.slane %v469_v33, 4  ;;  %v190_v35 = vmul.f32 %v469_v33, %v469_v33 }
 0x128   :  { %v474_v36 = vpop.f32.mrf.mxu0 }
 0x129   :  { %v177_v37 = vadd.f32 %v176_v34, %v469_v33  ;;  %v192_v38 = vrot.slane %v190_v35, 4  ;;  %v182_v39 = vrot.slane %v474_v36, 4  ;;  %v191_v40 = vmul.f32 %v474_v36, %v474_v36 }
 0x12b   :  { %v178_v41 = vrot.slane %v177_v37, 2  ;;  %v193_v42 = vadd.f32 %v192_v38, %v190_v35  ;;  %v183_v43 = vadd.f32 %v182_v39, %v474_v36  ;;  %v198_v44 = vrot.slane %v191_v40, 4 }
 0x12d   :  { %v179_v45 = vadd.f32 %v178_v41, %v177_v37  ;;  %v194_v46 = vrot.slane %v193_v42, 2  ;;  %v184_v47 = vrot.slane %v183_v43, 2  ;;  %v199_v48 = vadd.f32 %v198_v44, %v191_v40 }
 0x12f   :  { %v180_v49 = vrot.slane %v179_v45, 1  ;;  %v195_v50 = vadd.f32 %v194_v46, %v193_v42  ;;  %v185_v51 = vadd.f32 %v184_v47, %v183_v43  ;;  %v200_v52 = vrot.slane %v199_v48, 2 }
 0x131   :  { %v181_v53 = vadd.f32 %v180_v49, %v179_v45  ;;  %v196_v54 = vrot.slane %v195_v50, 1  ;;  %v186_v55 = vrot.slane %v185_v51, 1  ;;  %v201_v56 = vadd.f32 %v200_v52, %v199_v48 }
 0x133   :  { %v188_v57 = vmul.f32 0.125, %v181_v53  ;;  %v197_v58 = vadd.f32 %v196_v54, %v195_v50  ;;  %v187_v59 = vadd.f32 %v186_v55, %v185_v51  ;;  %v202_v60 = vrot.slane %v201_v56, 1 }
 0x135   :  { %v204_v61 = vmul.f32 0.125, %v197_v58  ;;  %v206_v62 = vmul.f32 %v188_v57, %v188_v57  ;;  %v189_v63 = vmul.f32 0.125, %v187_v59  ;;  %v203_v0 = vadd.f32 %v202_v60, %v201_v56 }
 0x137   :  { %v208_v1 = vsub.f32 %v204_v61, %v206_v62  ;;  %v205_v2 = vmul.f32 0.125, %v203_v0  ;;  %v207_v3 = vmul.f32 %v189_v63, %v189_v63 }
 0x139   :  { %v210_v4 = vmax.f32 %v208_v1, 0.0  ;;  %v209_v5 = vsub.f32 %v205_v2, %v207_v3 }
 0x13b   :  { %v212_v6 = vadd.f32 1e-05, %v210_v4  ;;  %v211_v7 = vmax.f32 %v209_v5, 0.0 }
 0x13d   :  { %v213_v8 = vadd.f32 1e-05, %v211_v7  ;;  %343 = vrsqrt.f32 %v212_v6 }
 0x13f   :  { %345 = vrsqrt.f32 %v213_v8 }
 0x14a   :  { %v344_v14 = vpop.eup %343 }
 0x14c   :  { %v346_v16 = vpop.eup %345 }
 0x14d   :  { %v218_v17 = vcombine.low %v344_v14, %v346_v16 }
 0x14f   :  { %v225_v18 = vrot.slane %v218_v17, %v224_v15 }
 0x151   :  { %v232_v20 = vrot.slane %v225_v18, %v224_v15 }
 0x153   :  { %v234_v23 = vmul.f32 %v232_v20, %v173_v19 }
 0x155   :  { %v239_v24 = vrot.slane %v234_v23, %v238_v21  ;;  %v243_v25 = vrot.slane %v234_v23, %v242_v22 }
 0x157   :  { %v246_v26 = vmul.f32 %v239_v24, %v188_v57  ;;  %v247_v27 = vmul.f32 %v243_v25, %v189_v63  ;;  %v268_v34 = vmul.f32 %v243_v25, %v474_v36  ;;  %v267_v37 = vmul.f32 %v239_v24, %v469_v33 }
 0x159   :  { %v250_v28 = vcombine.low %v246_v26, %v247_v27 }
 0x15b   :  { %v257_v29 = vrot.slane %v250_v28, %v224_v15 }
 0x15d   :  { %v264_v31 = vrot.slane %v257_v29, %v224_v15 }
 0x15f   :  { %v266_v32 = vsub.f32 %v175_v30, %v264_v31 }
 0x161   :  { %v277_v35 = vrot.slane %v266_v32, %v242_v22  ;;  %v273_v38 = vrot.slane %v266_v32, %v238_v21 }
 0x163   :  { %v281_v39 = vadd.f32 %v277_v35, %v268_v34  ;;  %v280_v40 = vadd.f32 %v273_v38, %v267_v37 }
 0x165   :  { %v282_v41 = vmax.f32 %v280_v40, 0.0  ;;  %v283_v42 = vmax.f32 %v281_v39, 0.0 }
 0x167   :  { %284 = vst [vmem:[#allocation9] sm:$0xff] %v282_v41  ;;  %285 = vst [vmem:[#allocation9 + $0x8] sm:$0xff] %v283_v42 }
 0x168   :  { %418 = shalt.err (!%p415_p5)
}
 0x169   :  { %295 = dma.vmem_to_hbm [thread:$0]  %s293_s2, 256, %s489_s3, [#allocation5]  }
 0x16a   :  { %431 = dma.done.wait [#allocation5], 256  }
 0x16b   :  { %432 = vsyncadd [#allocation5], 4294967040 }
 0x16c   :  { %299 = vsyncpa [#allocation4], 1 }
 0x16d   :  { %300 = vsyncpa [#allocation7], 1 }
 0x16e   :  { %301 = vsyncpa [#allocation5], 1 }

// kernel: tpu_custom_call.1
= control target key start
LH: loop header
LB: loop body
LE: loop exit
PB: predicated region body
PF: predicated region fallthrough
CT: control target
= control target key end

     0   :  { %8 = vsyncpa [#allocation4], 0  ;;  %s486_s0 = inlined_call_operand.hbm [shape: f32[8,128], index: 0, kind: input, shape index: {}]   ;;  %s487_s1 = inlined_call_operand.hbm [shape: f32[256,128], index: 1, kind: input, shape index: {}]   ;;  %s488_s2 = inlined_call_operand.hbm [shape: f32[2,256], index: 2, kind: input, shape index: {}]   ;;  %s489_s3 = inlined_call_operand.hbm [shape: f32[8,256], index: 3, kind: output, shape index: {}]  }
   0x1   :  { %9 = vsyncpa [#allocation7], 0 }
   0x2   :  { %10 = vsyncpa [#allocation5], 0  ;;  %s433_s12 = smov [#allocation6]  }
   0x3   :  { %s26_s13 = sshll.u32 %s433_s12, 4  ;;  %s27_s13 = int_to_ptr.vmem [resolvable:$true] %s26_s13 }
   0x4   :  { %s355_s14 = scalar_lea.vmem %s27_s13, 4096  ;;  %p360_p1 = scmp.lt.s32.totalorder %s27_s13, %s27_s13 }
   0x5   :  { %p356_p0 = scmp.ne.s32.totalorder %s27_s13, %s355_s14  ;;  %p361_p2 = scmp.lt.s32.totalorder %s355_s14, %s355_s14 }
   0x7   :  { %p362_p3 = por %p361_p2, %p360_p1 }
   0x9   :  { %p363_p4 = pnand %p362_p3, %p356_p0 }
   0xb   :  { %366 = shalt.err (!%p363_p4)
}
   0xc   :  { %s434_s15 = smov 128   ;;  %s435_s16 = smov 8  }
   0xd   :  { %32 = dma.hbm_to_vmem [thread:$0]  %s487_s1, 4096, %s27_s13, [#allocation7], %s434_s15, %s434_s15, %s435_s16  }
   0xe   :  { %s436_s19 = smov [#allocation3]   ;;  %s437_s21 = smov [#allocation8]  }
   0xf   :  { %s17_s20 = sshll.u32 %s436_s19, 4  ;;  %s39_s22 = sshll.u32 %s437_s21, 4  ;;  %s18_s20 = int_to_ptr.vmem [resolvable:$true] %s17_s20  ;;  %s40_s22 = int_to_ptr.vmem [resolvable:$true] %s39_s22 }
  0x10   :  { %s375_s23 = scalar_lea.vmem %s18_s20, 128  ;;  %p380_p6 = scmp.lt.s32.totalorder %s18_s20, %s18_s20 }
  0x11   :  { %p376_p5 = scmp.ne.s32.totalorder %s18_s20, %s375_s23  ;;  %p381_p7 = scmp.lt.s32.totalorder %s375_s23, %s375_s23 }
  0x13   :  { %p382_p8 = por %p381_p7, %p380_p6 }
  0x15   :  { %p383_p9 = pnand %p382_p8, %p376_p5 }
  0x17   :  { %386 = shalt.err (!%p383_p9)
}
  0x18   :  { %20 = dma.hbm_to_vmem [thread:$0]  %s486_s0, 128, %s18_s20, [#allocation4]  }
  0x19   :  { %s395_s26 = scalar_lea.vmem %s40_s22, 64  ;;  %p400_p11 = scmp.lt.s32.totalorder %s40_s22, %s40_s22 }
  0x1a   :  { %p396_p10 = scmp.ne.s32.totalorder %s40_s22, %s395_s26  ;;  %p401_p12 = scmp.lt.s32.totalorder %s395_s26, %s395_s26 }
  0x1c   :  { %p402_p13 = por %p401_p12, %p400_p11 }
  0x1e   :  { %p403_p0 = pnand %p402_p13, %p396_p10 }
  0x20   :  { %406 = shalt.err (!%p403_p0)
}
  0x21   :  { %42 = dma.hbm_to_vmem [thread:$0]  %s488_s2, 64, %s40_s22, [#allocation7]  }
  0x22   :  { %427 = dma.done.wait [#allocation4], 128  }
  0x23   :  { %428 = vsyncadd [#allocation4], 4294967168 }
  0x24   :  { %429 = dma.done.wait [#allocation7], 4160  }
  0x25   :  { %430 = vsyncadd [#allocation7], 4294963136  ;;  %v92_v0 = vld [vmem:[#allocation6 + $0xf8] sm:$0xff]  ;;  %v91_v2 = vld [vmem:[#allocation6 + $0xf0] sm:$0xff]  ;;  %s439_s0 = smov [#allocation9]  }
  0x26   :  { %v76_v1 = vld [vmem:[#allocation6 + $0x78] sm:$0xff]  ;;  %302 = vmatprep.subr.mxu0 %v92_v0  ;;  %v75_v3 = vld [vmem:[#allocation6 + $0x70] sm:$0xff]  ;;  %v90_v4 = vld [vmem:[#allocation6 + $0xe8] sm:$0xff]  ;;  %s292_s2 = sshll.u32 %s439_s0, 4  ;;  %s293_s2 = int_to_ptr.vmem [resolvable:$true] %s292_s2 }
  0x27   :  { %303 = vmatpush3.xpose.msra.mxu0 %v76_v1  ;;  %v74_v5 = vld [vmem:[#allocation6 + $0x68] sm:$0xff]  ;;  %v89_v6 = vld [vmem:[#allocation6 + $0xe0] sm:$0xff]  ;;  %v60_v7 = vld [vmem:[#allocation3] sm:$0xff]  ;;  %s407_s28 = scalar_lea.vmem %s293_s2, 256  ;;  %p412_p2 = scmp.lt.s32.totalorder %s293_s2, %s293_s2 }
  0x28   :  { %304 = vmatprep.subr.mxu0 %v91_v2  ;;  %v73_v8 = vld [vmem:[#allocation6 + $0x60] sm:$0xff]  ;;  %334 = vmatprep.mubr.f32.mxu0 %v60_v7  ;;  %v88_v9 = vld [vmem:[#allocation6 + $0xd8] sm:$0xff]  ;;  %v87_v11 = vld [vmem:[#allocation6 + $0xd0] sm:$0xff]  ;;  %p408_p1 = scmp.ne.s32.totalorder %s293_s2, %s407_s28  ;;  %p413_p3 = scmp.lt.s32.totalorder %s407_s28, %s407_s28 }
  0x29   :  { %v72_v10 = vld [vmem:[#allocation6 + $0x58] sm:$0xff]  ;;  %v71_v12 = vld [vmem:[#allocation6 + $0x50] sm:$0xff]  ;;  %v86_v13 = vld [vmem:[#allocation6 + $0xc8] sm:$0xff] }
  0x2a   :  { %v70_v14 = vld [vmem:[#allocation6 + $0x48] sm:$0xff]  ;;  %v85_v15 = vld [vmem:[#allocation6 + $0xc0] sm:$0xff]  ;;  %v84_v17 = vld [vmem:[#allocation6 + $0xb8] sm:$0xff]  ;;  %p414_p4 = por %p413_p3, %p412_p2 }
  0x2b   :  { %305 = vmatpush3.xpose.msra.mxu0 %v75_v3  ;;  %v69_v16 = vld [vmem:[#allocation6 + $0x40] sm:$0xff]  ;;  %v68_v18 = vld [vmem:[#allocation6 + $0x38] sm:$0xff]  ;;  %v83_v19 = vld [vmem:[#allocation6 + $0xb0] sm:$0xff] }
  0x2c   :  { %306 = vmatprep.subr.mxu0 %v90_v4  ;;  %v67_v20 = vld [vmem:[#allocation6 + $0x30] sm:$0xff]  ;;  %v82_v21 = vld [vmem:[#allocation6 + $0xa8] sm:$0xff]  ;;  %v81_v23 = vld [vmem:[#allocation6 + $0xa0] sm:$0xff]  ;;  %p415_p5 = pnand %p414_p4, %p408_p1 }
  0x2d   :  { %v66_v22 = vld [vmem:[#allocation6 + $0x28] sm:$0xff]  ;;  %v65_v24 = vld [vmem:[#allocation6 + $0x20] sm:$0xff]  ;;  %v80_v25 = vld [vmem:[#allocation6 + $0x98] sm:$0xff] }
  0x2e   :  { %v64_v26 = vld [vmem:[#allocation6 + $0x18] sm:$0xff]  ;;  %v79_v27 = vld [vmem:[#allocation6 + $0x90] sm:$0xff]  ;;  %v78_v29 = vld [vmem:[#allocation6 + $0x88] sm:$0xff] }
  0x2f   :  { %307 = vmatpush3.xpose.msra.mxu0 %v74_v5  ;;  %v63_v28 = vld [vmem:[#allocation6 + $0x10] sm:$0xff]  ;;  %v62_v30 = vld [vmem:[#allocation6 + $0x8] sm:$0xff]  ;;  %v77_v31 = vld [vmem:[#allocation6 + $0x80] sm:$0xff] }
  0x30   :  { %308 = vmatprep.subr.mxu0 %v89_v6  ;;  %v61_v32 = vld [vmem:[#allocation6] sm:$0xff] }
  0x33   :  { %309 = vmatpush3.xpose.msra.mxu0 %v73_v8 }
  0x34   :  { %310 = vmatprep.subr.mxu0 %v88_v9  ;;  %v438_v9 = vmov 1966171168  }
  0x37   :  { %311 = vmatpush3.xpose.msra.mxu0 %v72_v10  ;;  %v220_v10 = vunpack.c.l.s4 %v438_v9 }
  0x38   :  { %312 = vmatprep.subr.mxu0 %v87_v11  ;;  %v222_v11 = vlaneseq }
  0x3b   :  { %313 = vmatpush3.xpose.msra.mxu0 %v71_v12  ;;  %v221_v12 = vunpack.c.0.s8 %v220_v10 }
  0x3c   :  { %314 = vmatprep.subr.mxu0 %v86_v13  ;;  %v223_v13 = vshrl.u32 %v222_v11, 7 }
  0x3f   :  { %315 = vmatpush3.xpose.msra.mxu0 %v70_v14 }
  0x40   :  { %316 = vmatprep.subr.mxu0 %v85_v15  ;;  %v224_v15 = vsub.s32 %v221_v12, %v223_v13 }
  0x43   :  { %317 = vmatpush3.xpose.msra.mxu0 %v69_v16 }
  0x44   :  { %318 = vmatprep.subr.mxu0 %v84_v17 }
  0x47   :  { %319 = vmatpush3.xpose.msra.mxu0 %v68_v18 }
  0x48   :  { %320 = vmatprep.subr.mxu0 %v83_v19  ;;  %v173_v19 = vld [vmem:[#allocation8] ss:$2 sm:$0x3] }
  0x4b   :  { %321 = vmatpush3.xpose.msra.mxu0 %v67_v20 }
  0x4c   :  { %322 = vmatprep.subr.mxu0 %v82_v21  ;;  %v238_v21 = vsub.s32 0, %v223_v13 }
  0x4f   :  { %323 = vmatpush3.xpose.msra.mxu0 %v66_v22  ;;  %v242_v22 = vsub.s32 1, %v223_v13 }
  0x50   :  { %324 = vmatprep.subr.mxu0 %v81_v23 }
  0x53   :  { %325 = vmatpush3.xpose.msra.mxu0 %v65_v24 }
  0x54   :  { %326 = vmatprep.subr.mxu0 %v80_v25 }
  0x57   :  { %327 = vmatpush3.xpose.msra.mxu0 %v64_v26 }
  0x58   :  { %328 = vmatprep.subr.mxu0 %v79_v27 }
  0x5b   :  { %329 = vmatpush3.xpose.msra.mxu0 %v63_v28 }
  0x5c   :  { %330 = vmatprep.subr.mxu0 %v78_v29 }
  0x5f   :  { %331 = vmatpush3.xpose.msra.mxu0 %v62_v30  ;;  %v175_v30 = vld [vmem:[#allocation8 + $0x1] ss:$2 sm:$0x3] }
  0x60   :  { %332 = vmatprep.subr.mxu0 %v77_v31 }
  0x63   :  { %333 = vmatpush3.xpose.msra.mxu0 %v61_v32 }
  0x66   :  { %335 = vmatmul.mubr.f32.vlgmr.msra.gmra.mxu0 %v60_v7 }
 0x126   :  { %v469_v33 = vpop.f32.mrf.mxu0 }
 0x127   :  { %v176_v34 = vrot.slane %v469_v33, 4  ;;  %v190_v35 = vmul.f32 %v469_v33, %v469_v33 }
 0x128   :  { %v474_v36 = vpop.f32.mrf.mxu0 }
 0x129   :  { %v177_v37 = vadd.f32 %v176_v34, %v469_v33  ;;  %v192_v38 = vrot.slane %v190_v35, 4  ;;  %v182_v39 = vrot.slane %v474_v36, 4  ;;  %v191_v40 = vmul.f32 %v474_v36, %v474_v36 }
 0x12b   :  { %v178_v41 = vrot.slane %v177_v37, 2  ;;  %v193_v42 = vadd.f32 %v192_v38, %v190_v35  ;;  %v183_v43 = vadd.f32 %v182_v39, %v474_v36  ;;  %v198_v44 = vrot.slane %v191_v40, 4 }
 0x12d   :  { %v179_v45 = vadd.f32 %v178_v41, %v177_v37  ;;  %v194_v46 = vrot.slane %v193_v42, 2  ;;  %v184_v47 = vrot.slane %v183_v43, 2  ;;  %v199_v48 = vadd.f32 %v198_v44, %v191_v40 }
 0x12f   :  { %v180_v49 = vrot.slane %v179_v45, 1  ;;  %v195_v50 = vadd.f32 %v194_v46, %v193_v42  ;;  %v185_v51 = vadd.f32 %v184_v47, %v183_v43  ;;  %v200_v52 = vrot.slane %v199_v48, 2 }
 0x131   :  { %v181_v53 = vadd.f32 %v180_v49, %v179_v45  ;;  %v196_v54 = vrot.slane %v195_v50, 1  ;;  %v186_v55 = vrot.slane %v185_v51, 1  ;;  %v201_v56 = vadd.f32 %v200_v52, %v199_v48 }
 0x133   :  { %v188_v57 = vmul.f32 0.125, %v181_v53  ;;  %v197_v58 = vadd.f32 %v196_v54, %v195_v50  ;;  %v187_v59 = vadd.f32 %v186_v55, %v185_v51  ;;  %v202_v60 = vrot.slane %v201_v56, 1 }
 0x135   :  { %v204_v61 = vmul.f32 0.125, %v197_v58  ;;  %v206_v62 = vmul.f32 %v188_v57, %v188_v57  ;;  %v189_v63 = vmul.f32 0.125, %v187_v59  ;;  %v203_v0 = vadd.f32 %v202_v60, %v201_v56 }
 0x137   :  { %v208_v1 = vsub.f32 %v204_v61, %v206_v62  ;;  %v205_v2 = vmul.f32 0.125, %v203_v0  ;;  %v207_v3 = vmul.f32 %v189_v63, %v189_v63 }
 0x139   :  { %v210_v4 = vmax.f32 %v208_v1, 0.0  ;;  %v209_v5 = vsub.f32 %v205_v2, %v207_v3 }
 0x13b   :  { %v212_v6 = vadd.f32 1e-05, %v210_v4  ;;  %v211_v7 = vmax.f32 %v209_v5, 0.0 }
 0x13d   :  { %v213_v8 = vadd.f32 1e-05, %v211_v7  ;;  %343 = vrsqrt.f32 %v212_v6 }
 0x13f   :  { %345 = vrsqrt.f32 %v213_v8 }
 0x14a   :  { %v344_v14 = vpop.eup %343 }
 0x14c   :  { %v346_v16 = vpop.eup %345 }
 0x14d   :  { %v218_v17 = vcombine.low %v344_v14, %v346_v16 }
 0x14f   :  { %v225_v18 = vrot.slane %v218_v17, %v224_v15 }
 0x151   :  { %v232_v20 = vrot.slane %v225_v18, %v224_v15 }
 0x153   :  { %v234_v23 = vmul.f32 %v232_v20, %v173_v19 }
 0x155   :  { %v239_v24 = vrot.slane %v234_v23, %v238_v21  ;;  %v243_v25 = vrot.slane %v234_v23, %v242_v22 }
 0x157   :  { %v246_v26 = vmul.f32 %v239_v24, %v188_v57  ;;  %v247_v27 = vmul.f32 %v243_v25, %v189_v63  ;;  %v268_v34 = vmul.f32 %v243_v25, %v474_v36  ;;  %v267_v37 = vmul.f32 %v239_v24, %v469_v33 }
 0x159   :  { %v250_v28 = vcombine.low %v246_v26, %v247_v27 }
 0x15b   :  { %v257_v29 = vrot.slane %v250_v28, %v224_v15 }
 0x15d   :  { %v264_v31 = vrot.slane %v257_v29, %v224_v15 }
 0x15f   :  { %v266_v32 = vsub.f32 %v175_v30, %v264_v31 }
 0x161   :  { %v277_v35 = vrot.slane %v266_v32, %v242_v22  ;;  %v273_v38 = vrot.slane %v266_v32, %v238_v21 }
 0x163   :  { %v281_v39 = vadd.f32 %v277_v35, %v268_v34  ;;  %v280_v40 = vadd.f32 %v273_v38, %v267_v37 }
 0x165   :  { %v282_v41 = vmax.f32 %v280_v40, 0.0  ;;  %v283_v42 = vmax.f32 %v281_v39, 0.0 }
 0x167   :  { %284 = vst [vmem:[#allocation9] sm:$0xff] %v282_v41  ;;  %285 = vst [vmem:[#allocation9 + $0x8] sm:$0xff] %v283_v42 }
 0x168   :  { %418 = shalt.err (!%p415_p5)
}
 0x169   :  { %295 = dma.vmem_to_hbm [thread:$0]  %s293_s2, 256, %s489_s3, [#allocation5]  }
 0x16a   :  { %431 = dma.done.wait [#allocation5], 256  }
 0x16b   :  { %432 = vsyncadd [#allocation5], 4294967040 }
 0x16c   :  { %299 = vsyncpa [#allocation4], 1 }
 0x16d   :  { %300 = vsyncpa [#allocation7], 1 }
 0x16e   :  { %301 = vsyncpa [#allocation5], 1 }

</bundles_post_ra>
